<compile_context>
chip_gen: v5e
topology: v5e:2x2
jax: 0.10.0
libtpu: 0.0.40
codegen_flags: <defaults>
</compile_context>

<pallas_src>
import functools

import jax
import jax.numpy as jnp
from jax import lax
from jax.experimental import pallas as pl
from jax.experimental.pallas import tpu as pltpu


# ---------------------------------------------------------------------------
# One-time probe: pin down pltpu.roll's rotate direction so the 3x3 tap shifts
# are correct under either rotate convention.  Runs a trivial kernel once.
# ---------------------------------------------------------------------------
@functools.lru_cache(maxsize=None)
def _roll_shift_sign():
    def probe(x_ref, o_ref):
        o_ref[...] = pltpu.roll(x_ref[...], 1, 0)

    x = jnp.broadcast_to(jnp.arange(8, dtype=jnp.float32)[:, None], (8, 128))
    out = pl.pallas_call(
        probe, out_shape=jax.ShapeDtypeStruct((8, 128), jnp.float32))(x)
    first = float(out[0, 0])
    if first == 7.0:      # jnp.roll convention: out[i] = in[(i - shift) % n]
        return -1
    if first == 1.0:      # inverse convention:  out[i] = in[(i + shift) % n]
        return 1
    raise AssertionError(f"unexpected pltpu.roll semantics (probe saw {first})")


# ---------------------------------------------------------------------------
# Fused kernel: conv1(1x1)+BN+ReLU -> conv2(3x3)+BN+ReLU -> conv3(1x1)+BN
# -> residual add -> ReLU, for one block of `R` flattened image rows.
# ---------------------------------------------------------------------------
def _make_bottleneck_kernel(W, R, P, compute_dtype, fuse_k, roll_sign):
    f32 = jnp.float32
    offs = [(oy, ox) for oy in (-1, 0, 1) for ox in (-1, 0, 1)]

    def kernel(x_ref, w1_ref, sb1_ref, w2_ref, sb2_ref, w3_ref, sb3_ref,
               mask_ref, o_ref):
        # ---- conv1 (1x1) + BN + ReLU: operand cast straight to compute dtype.
        xc = x_ref[...].astype(compute_dtype)
        h1 = jnp.dot(xc, w1_ref[...], preferred_element_type=f32)
        h1 = jnp.maximum(h1 * sb1_ref[0:1, :] + sb1_ref[1:2, :], 0.0)  # (R,P) f32

        # ---- conv2 (3x3, pad=1): 9 flat-row shifts via XLU rolls + boundary
        # masks (no padded scratch, no strided window copies, no scratch zero).
        # Rolls stay 32-bit (guaranteed sublane-rotate support); the cast to
        # compute dtype happens per tap right before feeding the MXU.
        def tap(idx):
            oy, ox = offs[idx]
            s = oy * W + ox
            if s == 0:
                t = h1
            else:
                t = (pltpu.roll(h1, (roll_sign * s) % R, 0)
                     * mask_ref[:, idx:idx + 1])
            return t.astype(compute_dtype)

        if fuse_k:
            # Deep contraction: one (R, 9P) @ (9P, P) matmul (v6e/v7x MXU depth).
            xcol = jnp.concatenate([tap(t) for t in range(9)], axis=1)
            acc = jnp.dot(xcol, w2_ref[...], preferred_element_type=f32)
        else:
            acc = jnp.zeros((R, P), f32)
            for t in range(9):
                acc = acc + jnp.dot(tap(t), w2_ref[t],
                                    preferred_element_type=f32)
        h2 = jnp.maximum(acc * sb2_ref[0:1, :] + sb2_ref[1:2, :], 0.0)  # (R,P) f32

        # ---- conv3 (1x1) + BN + residual + ReLU.  Residual re-reads x_ref
        # (cheap VMEM load) so an f32 copy of x is not live across the matmuls.
        y = jnp.dot(h2.astype(compute_dtype), w3_ref[...],
                    preferred_element_type=f32)
        y = y * sb3_ref[0:1, :] + sb3_ref[1:2, :] + x_ref[...].astype(f32)
        o_ref[...] = jnp.maximum(y, 0.0).astype(o_ref.dtype)

    return kernel


# ---------------------------------------------------------------------------
# NHWC-native entry point (production path: keep activations NHWC end-to-end).
# ---------------------------------------------------------------------------
def bottleneck_forward_nhwc(x_nhwc, params, *, compute_dtype=jnp.float32,
                            images_per_block=1, expansion=4):
    # TODO(synk): stride>1 / downsample branch not implemented (module defaults
    #             stride=1, downsample=None, i.e. inplanes == planes*4).
    N, H, W, Cin = x_nhwc.shape
    P = params["w1"].shape[0]            # planes
    Cout = P * expansion
    assert Cin == Cout, "residual add requires inplanes == planes * expansion"
    assert N % images_per_block == 0
    HW = H * W
    R = images_per_block * HW            # flattened rows per grid step
    # (8,128) rule on the row dim.  TODO(synk): pad rows for stages where HW is
    # not a multiple of 8 (e.g. 14x14) instead of requiring one whole-batch block.
    assert R % 8 == 0 or R == N * HW
    eps = params["eps"]

    # Wrapper-side flattening: (N,H,W,C) -> (N*HW, C).  Free for contiguous
    # NHWC, gives the kernel lane-dense 2D blocks and unmasked output stores.
    x2d = x_nhwc.reshape(N * HW, Cin)

    # BN (inference, running stats) as post-matmul f32 scale/bias rows, so bf16
    # weight rounding is not amplified by gamma/sqrt(var+eps).
    def scale_bias(bn):
        gamma, beta, mean, var = bn
        s = gamma / jnp.sqrt(var + eps)
        return jnp.stack([s, beta - mean * s]).astype(jnp.float32)    # (2, C)

    sb1 = scale_bias(params["bn1"])
    sb2 = scale_bias(params["bn2"])
    sb3 = scale_bias(params["bn3"])
    w1m = params["w1"][:, :, 0, 0].T.astype(compute_dtype)            # (Cin, P)
    w2m = jnp.transpose(params["w2"], (2, 3, 1, 0))                   # (3,3,P,P)
    w3m = params["w3"][:, :, 0, 0].T.astype(compute_dtype)            # (P, Cout)

    # Deep-K conv2 (single (R,9P)@(9P,P)) only when P is lane-aligned; the tiny
    # demo channel counts take the 9-matmul fallback.  (Per review: perf
    # conclusions require real >=128-channel stages.)
    fuse_k = (P % 128 == 0)
    if fuse_k:
        w2m = w2m.reshape(9 * P, P).astype(compute_dtype)
        w2_spec = pl.BlockSpec((9 * P, P), lambda n: (0, 0))
    else:
        w2m = w2m.reshape(9, P, P).astype(compute_dtype)
        w2_spec = pl.BlockSpec((9, P, P), lambda n: (0, 0, 0))

    # Per-row 3x3 boundary masks (identical for every block since each block
    # starts on an image boundary) -> tiny (R, 9) f32 input, no in-kernel
    # iota / integer div / mod.
    rr = jnp.arange(R, dtype=jnp.int32) % HW
    yy, xx = rr // W, rr % W
    cols = []
    for oy in (-1, 0, 1):
        for ox in (-1, 0, 1):
            cols.append((yy + oy >= 0) & (yy + oy < H) &
                        (xx + ox >= 0) & (xx + ox < W))
    masks = jnp.stack(cols, axis=1).astype(jnp.float32)               # (R, 9)

    # VMEM budget: explicit 2x for the double-buffered specs (no arbitrary 4x),
    # capped at 48 MiB so it also fits v7x's 64 MiB physical VMEM.
    w_b = jnp.dtype(compute_dtype).itemsize
    weight_bytes = ((Cin * P + 9 * P * P + P * Cout) * w_b
                    + 3 * 2 * max(P, Cout) * 4 + R * 9 * 4)
    work_bytes = 6 * R * P * 4 + (R * 9 * P * w_b if fuse_k else R * P * w_b)
    est = (2 * R * Cin * 4 + 2 * R * Cout * 4   # x/out tiles, double-buffered
           # TODO(synk): pl.Buffered(1) on the grid-invariant weight specs
           # would make the next term 1x (worth it on v7x at planes>=512).
           + 2 * weight_bytes
           + work_bytes)
    vmem_limit = int(min(max(int(est * 1.25), 32 << 20), 48 << 20))

    kernel = _make_bottleneck_kernel(W, R, P, compute_dtype, fuse_k,
                                     _roll_shift_sign())
    out2d = pl.pallas_call(
        kernel,
        out_shape=jax.ShapeDtypeStruct((N * HW, Cout), x_nhwc.dtype),
        grid=(N * HW // R,),
        in_specs=[
            pl.BlockSpec((R, Cin), lambda n: (n, 0)),        # x rows
            pl.BlockSpec((Cin, P), lambda n: (0, 0)),        # w1 (grid-invariant)
            pl.BlockSpec((2, P), lambda n: (0, 0)),          # bn1 scale/bias
            w2_spec,                                         # w2
            pl.BlockSpec((2, P), lambda n: (0, 0)),          # bn2 scale/bias
            pl.BlockSpec((P, Cout), lambda n: (0, 0)),       # w3
            pl.BlockSpec((2, Cout), lambda n: (0, 0)),       # bn3 scale/bias
            pl.BlockSpec((R, 9), lambda n: (0, 0)),          # 3x3 boundary masks
        ],
        out_specs=pl.BlockSpec((R, Cout), lambda n: (n, 0)),
        compiler_params=pltpu.CompilerParams(
            dimension_semantics=("parallel",),
            vmem_limit_bytes=vmem_limit),
    )(x2d, w1m, sb1, w2m, sb2, w3m, sb3, masks)

    return out2d.reshape(N, H, W, Cout)


# ---------------------------------------------------------------------------
# NCHW adapter (PyTorch module API).
# ---------------------------------------------------------------------------
def bottleneck_forward(x_nchw, params, **kw):
    # TODO(synk): in a full network keep activations NHWC end-to-end and call
    # bottleneck_forward_nhwc directly; these two transposes are HBM round
    # trips that exist only to match the NCHW module API.
    x = jnp.transpose(x_nchw, (0, 2, 3, 1))
    out = bottleneck_forward_nhwc(x, params, **kw)
    return jnp.transpose(out, (0, 3, 1, 2))


# ---------------------------------------------------------------------------
# Parameter construction (deterministic; matches nn.Module __init__ shapes)
# ---------------------------------------------------------------------------
def make_params(key, inplanes, planes, expansion=4):
    ks = jax.random.split(key, 15)
    eps = 1e-5

    def bn_params(kg, kb, km, kv, c):
        gamma = 1.0 + 0.1 * jax.random.normal(kg, (c,), jnp.float32)
        beta = 0.1 * jax.random.normal(kb, (c,), jnp.float32)
        mean = 0.1 * jax.random.normal(km, (c,), jnp.float32)
        var = jax.random.uniform(kv, (c,), jnp.float32, 0.5, 1.5)
        return gamma, beta, mean, var

    return {
        "w1": 0.1 * jax.random.normal(ks[0], (planes, inplanes, 1, 1), jnp.float32),
        "w2": 0.1 * jax.random.normal(ks[1], (planes, planes, 3, 3), jnp.float32),
        "w3": 0.1 * jax.random.normal(ks[2], (planes * expansion, planes, 1, 1), jnp.float32),
        "bn1": bn_params(ks[3], ks[4], ks[5], ks[6], planes),
        "bn2": bn_params(ks[7], ks[8], ks[9], ks[10], planes),
        "bn3": bn_params(ks[11], ks[12], ks[13], ks[14], planes * expansion),
        "eps": eps,
    }


# ---------------------------------------------------------------------------
# Pure-JAX reference (PyTorch semantics, eval-mode BN) for verification
# ---------------------------------------------------------------------------
def reference_forward(x, params, expansion=4):
    eps = params["eps"]

    def conv(x, w, pad):
        return lax.conv_general_dilated(
            x, w, (1, 1), [(pad, pad), (pad, pad)],
            dimension_numbers=("NCHW", "OIHW", "NCHW"))

    def bn(x, bnp):
        gamma, beta, mean, var = bnp
        s = gamma / jnp.sqrt(var + eps)
        b = beta - mean * s
        return x * s[None, :, None, None] + b[None, :, None, None]

    out = jax.nn.relu(bn(conv(x, params["w1"], 0), params["bn1"]))
    out = jax.nn.relu(bn(conv(out, params["w2"], 1), params["bn2"]))
    out = bn(conv(out, params["w3"], 0), params["bn3"])
    return jax.nn.relu(out + x)


if __name__ == "__main__":
    # NOTE: tiny shapes are for correctness only — perf tuning must use real
    # bottleneck channel counts (multiples of 128), per the review.
    inplanes, planes = 16, 4            # inplanes == planes * expansion (no downsample)
    N, H, W = 2, 16, 16

    key = jax.random.PRNGKey(0)
    kx, kp = jax.random.split(key)
    x = jax.random.normal(kx, (N, inplanes, H, W), jnp.float32)   # NCHW, as PyTorch
    params = make_params(kp, inplanes, planes)

    _roll_shift_sign()                  # warm the roll-direction probe (outside jit)

    ref = jax.block_until_ready(reference_forward(x, params))

    # f32 path: exact check against the reference.
    fwd_f32 = jax.jit(functools.partial(bottleneck_forward, compute_dtype=jnp.float32))
    out = jax.block_until_ready(fwd_f32(x, params))
    assert out.shape == (N, inplanes, H, W)
    assert jnp.allclose(out, ref, atol=1e-4, rtol=1e-4), \
        f"f32 max abs err {jnp.max(jnp.abs(out - ref))}"

    # Multi-image-per-grid-step path (v5e/v6e: amortizes per-step overhead).
    fwd_b2 = jax.jit(functools.partial(bottleneck_forward,
                                       compute_dtype=jnp.float32,
                                       images_per_block=2))
    out_b2 = jax.block_until_ready(fwd_b2(x, params))
    assert jnp.allclose(out_b2, ref, atol=1e-4, rtol=1e-4), \
        f"batched max abs err {jnp.max(jnp.abs(out_b2 - ref))}"

    # bf16 MXU path (weights + matmul operands bf16, f32 accumulate): loose check.
    fwd_bf16 = jax.jit(functools.partial(bottleneck_forward, compute_dtype=jnp.bfloat16))
    out_bf16 = jax.block_until_ready(fwd_bf16(x, params))
    assert jnp.allclose(out_bf16, ref, atol=5e-2, rtol=5e-2), \
        f"bf16 max abs err {jnp.max(jnp.abs(out_bf16 - ref))}"

    print("KERNEL_OK")
</pallas_src>

<mosaic_0001>
module attributes {stable_mosaic.version = 11 : i64} {
  func.func @probe(%arg0: memref<8x128xf32, #tpu.memory_space<vmem>>, %arg1: memref<8x128xf32, #tpu.memory_space<vmem>>) attributes {dimension_semantics = [], scalar_prefetch = 0 : i64, scratch_operands = 0 : i64, tpu.core_type = #tpu.core_type<tc>} {
    %c0 = arith.constant 0 : index
    %c0_0 = arith.constant 0 : index
    %0 = vector.load %arg0[%c0, %c0_0] : memref<8x128xf32, #tpu.memory_space<vmem>>, vector<8x128xf32>
    %c1_i32 = arith.constant 1 : i32
    %1 = tpu.dynamic_rotate %0 by %c1_i32 dim 0 : vector<8x128xf32>, i32 -> vector<8x128xf32>
    %c0_1 = arith.constant 0 : index
    %c0_2 = arith.constant 0 : index
    %2 = vector.load %arg1[%c0_1, %c0_2] : memref<8x128xf32, #tpu.memory_space<vmem>>, vector<8x128xf32>
    tpu.vector_store %arg1[%c0_1, %c0_2], %1 {strides = array<i32>} : memref<8x128xf32, #tpu.memory_space<vmem>>, vector<8x128xf32>,
    return
  }
}

</mosaic_0001>

<bundles_post_ra>
// kernel: tpu_custom_call.1
= control target key start
LH: loop header
LB: loop body
LE: loop exit
PB: predicated region body
PF: predicated region fallthrough
CT: control target
= control target key end

     0   :  { %6 = vsyncpa [#allocation3], 0  ;;  %s115_s0 = inlined_call_operand.hbm [shape: f32[8,128], index: 0, kind: input, shape index: {}]   ;;  %s116_s1 = inlined_call_operand.hbm [shape: f32[8,128], index: 1, kind: output, shape index: {}]  }
   0x1   :  { %7 = vsyncpa [#allocation4], 0  ;;  %s13_s8 = sshll.u32 %s115_s0, 4  ;;  %s97_s9 = smov [#allocation2]   ;;  %s14_s8 = int_to_ptr.hbm [resolvable:$true] %s13_s8 }
   0x2   :  { %s15_s10 = sshll.u32 %s97_s9, 4  ;;  %s16_s10 = int_to_ptr.vmem [resolvable:$true] %s15_s10 }
   0x3   :  { %18 = dma.hbm_to_vmem [thread:$0]  %s14_s8, 128, %s16_s10, [#allocation3]  }
   0x4   :  { %93 = dma.done.wait [#allocation3], 128  }
   0x5   :  { %94 = vsyncadd [#allocation3], 4294967168  ;;  %s98_s11 = smov [#allocation5]   ;;  %s33_s15 = sshll.u32 %s116_s1, 4  ;;  %v23_v0 = vld [vmem:[#allocation2] sm:$0xff]  ;;  %s34_s15 = int_to_ptr.hbm [resolvable:$true] %s33_s15 }
   0x6   :  { %s31_s12 = sshll.u32 %s98_s11, 4  ;;  %v24_v1 = vrot.slane %v23_v0, 7  ;;  %s32_s12 = int_to_ptr.vmem [resolvable:$true] %s31_s12 }
   0x8   :  { %25 = vst [vmem:[#allocation5] sm:$0xff] %v24_v1 }
   0x9   :  { %36 = dma.vmem_to_hbm [thread:$0]  %s32_s12, 128, %s34_s15, [#allocation4]  }
   0xa   :  { %95 = dma.done.wait [#allocation4], 128  }
   0xb   :  { %96 = vsyncadd [#allocation4], 4294967168 }
   0xc   :  { %41 = vsyncpa [#allocation3], 1 }
   0xd   :  { %42 = vsyncpa [#allocation4], 1 }

</bundles_post_ra>
